<compile_context>
chip_gen: v7x
topology: tpu7x:2x2x1
jax: 0.10.0
libtpu: 0.0.40
codegen_flags: <defaults>
</compile_context>

<pallas_src>
import functools

import jax
import jax.numpy as jnp
from jax.experimental import pallas as pl
from jax.experimental.pallas import tpu as pltpu


# ----------------------------------------------------------------------------
# Fused kernel: embedding -> convs -> ReLU -> maxpool -> concat -> FC -> softmax
# ----------------------------------------------------------------------------
def _cnn_fused_kernel(x_ref, emb_ref, wsc_ref, bsc_ref, fcw_ref, fcb_ref,
                      probs_ref, feat_ref, *, B, L, D, NF, kernel_sizes):
    V = emb_ref.shape[0]
    NK = len(kernel_sizes)
    FT = NK * NF
    BL = B * L

    # --- Embedding gather: one-hot @ table (table stays resident in VMEM) ---
    idx = x_ref[...]                                               # [BL, 1] int32
    iota_v = jax.lax.broadcasted_iota(jnp.int32, (BL, V), 1)       # [BL, V]
    onehot = jnp.where(iota_v == idx, 1.0, 0.0).astype(jnp.float32)
    emb = jnp.dot(onehot, emb_ref[...],
                  preferred_element_type=jnp.float32)              # [BL, D]

    wsc = wsc_ref[...]                                             # [sum(k)*D, FT]
    bsc = bsc_ref[...]                                             # [NK, FT]

    # --- Conv blocks via shifted matmuls + bias + ReLU + max-pool ---
    feat_rows = []
    for b in range(B):                                             # B is tiny/static
        fb = None
        row_off = 0
        for i, k in enumerate(kernel_sizes):
            Lk = L - k + 1
            s = None
            for j in range(k):
                e_j = emb[b * L + j:b * L + j + Lk, :]             # [Lk, D]
                w_j = wsc[row_off + j * D:row_off + (j + 1) * D, :]  # [D, FT]
                p = jnp.dot(e_j, w_j, preferred_element_type=jnp.float32)
                s = p if s is None else s + p                      # [Lk, FT]
            row_off += k * D
            h = jnp.maximum(s + bsc[i:i + 1, :], 0.0)              # bias + ReLU
            pk = jnp.max(h, axis=0, keepdims=True)                 # MaxPool1d -> [1, FT]
            # Filter bank k only occupies columns f*NK + i; the other columns
            # are exactly 0 after ReLU, so summing the NK pooled slabs yields
            # the torch.cat(dim=2).view(B,-1) ordering directly.
            fb = pk if fb is None else fb + pk
        feat_rows.append(fb)

    feat = jnp.concatenate(feat_rows, axis=0)                      # [B, FT]
    feat_ref[...] = feat

    # --- FC + softmax (kept in the same kernel) ---
    logits = jnp.dot(feat, fcw_ref[...],
                     preferred_element_type=jnp.float32) + fcb_ref[...]
    m = jnp.max(logits, axis=1, keepdims=True)
    e = jnp.exp(logits - m)
    denom = jnp.sum(e, axis=1, keepdims=True)
    r = pl.reciprocal(denom, approx=True)                          # EUP slot
    r = r * (2.0 - denom * r)                                      # 1 Newton step
    probs_ref[...] = e * r


# ----------------------------------------------------------------------------
# Wrapper: one pallas_call, no grid, everything in VMEM
# ----------------------------------------------------------------------------
def cnn_forward(kparams, x_idx, *, kernel_sizes, num_filters):
    B, L = x_idx.shape
    V, D = kparams["embedding"].shape
    NK = len(kernel_sizes)
    FT = NK * num_filters
    C = kparams["fc_wt"].shape[1]

    x2 = x_idx.reshape(B * L, 1).astype(jnp.int32)

    kernel = functools.partial(
        _cnn_fused_kernel, B=B, L=L, D=D, NF=num_filters,
        kernel_sizes=tuple(kernel_sizes))

    vmem = pl.BlockSpec(memory_space=pltpu.MemorySpace.VMEM)
    probs, feat = pl.pallas_call(
        kernel,
        out_shape=(jax.ShapeDtypeStruct((B, C), jnp.float32),
                   jax.ShapeDtypeStruct((B, FT), jnp.float32)),
        in_specs=[vmem] * 6,
        out_specs=(vmem, vmem),
    )(x2, kparams["embedding"], kparams["conv_wsc"], kparams["conv_bsc"],
      kparams["fc_wt"], kparams["fc_b"])
    # TODO(synk): F.dropout(p=0.3, training=True) omitted -- inference-mode identity.
    return probs, feat


# ----------------------------------------------------------------------------
# Parameters (raw PyTorch-style) + kernel-layout packing
# ----------------------------------------------------------------------------
def init_raw_params(key, vocab_size, D, kernel_sizes, NF, C=2):
    n_keys = 1 + 2 * len(kernel_sizes) + 2
    keys = jax.random.split(key, n_keys)
    raw = {"embedding": 0.1 * jax.random.normal(
        keys[0], (vocab_size, D), jnp.float32)}
    for i, k in enumerate(kernel_sizes):
        raw[f"conv_w_{k}"] = 0.05 * jax.random.normal(
            keys[1 + 2 * i], (NF, k * D), jnp.float32)      # Conv1d weight [F, k*D]
        raw[f"conv_b_{k}"] = 0.05 * jax.random.normal(
            keys[2 + 2 * i], (NF,), jnp.float32)
    raw["fc_w"] = 0.05 * jax.random.normal(
        keys[-2], (C, NF * len(kernel_sizes)), jnp.float32)  # nn.Linear weight
    raw["fc_b"] = 0.05 * jax.random.normal(keys[-1], (C,), jnp.float32)
    return raw


def pack_params_for_kernel(raw, kernel_sizes, D, NF, C=2):
    """Scatter each filter bank into disjoint columns f*NK+i of a [*, NK*NF] slab."""
    NK = len(kernel_sizes)
    FT = NK * NF
    wsc_blocks = []
    bsc = jnp.zeros((NK, FT), jnp.float32)
    for i, k in enumerate(kernel_sizes):
        w = raw[f"conv_w_{k}"]                                       # [NF, k*D]
        blk = jnp.zeros((k * D, FT), jnp.float32).at[:, i::NK].set(w.T)
        wsc_blocks.append(blk)
        bsc = bsc.at[i, i::NK].set(raw[f"conv_b_{k}"])
    return {
        "embedding": raw["embedding"],                               # [V, D]
        "conv_wsc": jnp.concatenate(wsc_blocks, axis=0),             # [sum(k)*D, FT]
        "conv_bsc": bsc,                                             # [NK, FT]
        "fc_wt": raw["fc_w"].T,                                      # [FT, C]
        "fc_b": raw["fc_b"].reshape(1, C),                           # [1, C]
    }


# ----------------------------------------------------------------------------
# Pure-JAX reference of the PyTorch forward (for correctness checking)
# ----------------------------------------------------------------------------
def reference_forward(raw, x_idx, kernel_sizes):
    emb = jnp.take(raw["embedding"], x_idx, axis=0)                  # [B, L, D]
    B, L, D = emb.shape
    pooled = []
    for k in kernel_sizes:
        Lk = L - k + 1
        w = raw[f"conv_w_{k}"]                                       # [NF, k*D]
        bk = raw[f"conv_b_{k}"]
        win = jnp.stack([emb[:, p:p + k, :].reshape(B, k * D)
                         for p in range(Lk)], axis=1)                # [B, Lk, k*D]
        s = jnp.einsum("bpc,fc->bpf", win, w) + bk
        pooled.append(jnp.max(jnp.maximum(s, 0.0), axis=1))          # [B, NF]
    feat = jnp.stack(pooled, axis=2).reshape(B, -1)                  # cat(dim=2).view
    logits = feat @ raw["fc_w"].T + raw["fc_b"]
    return jax.nn.softmax(logits, axis=1), feat


# ----------------------------------------------------------------------------
if __name__ == "__main__":
    key = jax.random.PRNGKey(0)
    k_params, k_x = jax.random.split(key)

    # Small shapes consistent with the module's forward.
    batch = 2
    sentence_len = 12
    embedding_dim = 16
    num_filters = 32
    vocab_size = 50
    kernel_sizes = (3, 4, 5)
    num_classes = 2

    raw = init_raw_params(k_params, vocab_size, embedding_dim,
                          kernel_sizes, num_filters, num_classes)
    kparams = pack_params_for_kernel(raw, kernel_sizes, embedding_dim,
                                     num_filters, num_classes)

    x_idx = jax.random.randint(k_x, (batch, sentence_len), 0, vocab_size,
                               dtype=jnp.int32)

    fwd = jax.jit(functools.partial(cnn_forward, kernel_sizes=kernel_sizes,
                                    num_filters=num_filters))
    probs, feat = fwd(kparams, x_idx)
    jax.block_until_ready((probs, feat))

    probs_ref, feat_ref = reference_forward(raw, x_idx, kernel_sizes)

    assert probs.shape == (batch, num_classes)
    assert feat.shape == (batch, num_filters * len(kernel_sizes))
    assert bool(jnp.allclose(jnp.sum(probs, axis=1), 1.0, atol=1e-5))
    assert bool(jnp.allclose(feat, feat_ref, atol=2e-3, rtol=2e-3))
    assert bool(jnp.allclose(probs, probs_ref, atol=2e-3, rtol=2e-3))

    print("KERNEL_OK")
</pallas_src>

<mosaic_0001>
module attributes {stable_mosaic.version = 11 : i64} {
  func.func @_cnn_fused_kernel(%arg0: memref<24x1xi32, #tpu.memory_space<vmem>>, %arg1: memref<50x16xf32, #tpu.memory_space<vmem>>, %arg2: memref<192x96xf32, #tpu.memory_space<vmem>>, %arg3: memref<3x96xf32, #tpu.memory_space<vmem>>, %arg4: memref<96x2xf32, #tpu.memory_space<vmem>>, %arg5: memref<1x2xf32, #tpu.memory_space<vmem>>, %arg6: memref<2x2xf32, #tpu.memory_space<vmem>>, %arg7: memref<2x96xf32, #tpu.memory_space<vmem>>) attributes {dimension_semantics = [], scalar_prefetch = 0 : i64, scratch_operands = 0 : i64, tpu.core_type = #tpu.core_type<tc>} {
    %c0 = arith.constant 0 : index
    %c0_0 = arith.constant 0 : index
    %0 = vector.load %arg0[%c0, %c0_0] : memref<24x1xi32, #tpu.memory_space<vmem>>, vector<24x1xi32>
    %1 = tpu.iota {dimensions = array<i32: 1>} : vector<24x50xi32>
    %2 = vector.broadcast %0 : vector<24x1xi32> to vector<24x50xi32>
    %3 = arith.cmpi eq, %1, %2 : vector<24x50xi32>
    %cst = arith.constant 1.000000e+00 : f32
    %cst_1 = arith.constant 0.000000e+00 : f32
    %4 = vector.broadcast %cst : f32 to vector<24x50xf32>
    %5 = vector.broadcast %cst_1 : f32 to vector<24x50xf32>
    %6 = arith.select %3, %4, %5 : vector<24x50xi1>, vector<24x50xf32>
    %c0_2 = arith.constant 0 : index
    %c0_3 = arith.constant 0 : index
    %7 = vector.load %arg1[%c0_2, %c0_3] : memref<50x16xf32, #tpu.memory_space<vmem>>, vector<50x16xf32>
    %cst_4 = arith.constant dense<0.000000e+00> : vector<24x16xf32>
    %8 = tpu.matmul %6, %7, %cst_4 {dimension_numbers = #tpu.dot_dimension_numbers<[1], [0], [0], [1], [0, 0, 1, 1], [], []>} : vector<24x50xf32>, vector<50x16xf32>, vector<24x16xf32> -> vector<24x16xf32>
    %c0_5 = arith.constant 0 : index
    %c0_6 = arith.constant 0 : index
    %9 = vector.load %arg2[%c0_5, %c0_6] : memref<192x96xf32, #tpu.memory_space<vmem>>, vector<192x96xf32>
    %c0_7 = arith.constant 0 : index
    %c0_8 = arith.constant 0 : index
    %10 = vector.load %arg3[%c0_7, %c0_8] : memref<3x96xf32, #tpu.memory_space<vmem>>, vector<3x96xf32>
    %11 = vector.extract_strided_slice %8 {offsets = [0, 0], sizes = [10, 16], strides = [1, 1]} : vector<24x16xf32> to vector<10x16xf32>
    %12 = vector.extract_strided_slice %9 {offsets = [0, 0], sizes = [16, 96], strides = [1, 1]} : vector<192x96xf32> to vector<16x96xf32>
    %cst_9 = arith.constant dense<0.000000e+00> : vector<10x96xf32>
    %13 = tpu.matmul %11, %12, %cst_9 {dimension_numbers = #tpu.dot_dimension_numbers<[1], [0], [0], [1], [0, 0, 1, 1], [], []>} : vector<10x16xf32>, vector<16x96xf32>, vector<10x96xf32> -> vector<10x96xf32>
    %14 = vector.extract_strided_slice %8 {offsets = [1, 0], sizes = [10, 16], strides = [1, 1]} : vector<24x16xf32> to vector<10x16xf32>
    %15 = vector.extract_strided_slice %9 {offsets = [16, 0], sizes = [16, 96], strides = [1, 1]} : vector<192x96xf32> to vector<16x96xf32>
    %cst_10 = arith.constant dense<0.000000e+00> : vector<10x96xf32>
    %16 = tpu.matmul %14, %15, %cst_10 {dimension_numbers = #tpu.dot_dimension_numbers<[1], [0], [0], [1], [0, 0, 1, 1], [], []>} : vector<10x16xf32>, vector<16x96xf32>, vector<10x96xf32> -> vector<10x96xf32>
    %17 = arith.addf %13, %16 : vector<10x96xf32>
    %18 = vector.extract_strided_slice %8 {offsets = [2, 0], sizes = [10, 16], strides = [1, 1]} : vector<24x16xf32> to vector<10x16xf32>
    %19 = vector.extract_strided_slice %9 {offsets = [32, 0], sizes = [16, 96], strides = [1, 1]} : vector<192x96xf32> to vector<16x96xf32>
    %cst_11 = arith.constant dense<0.000000e+00> : vector<10x96xf32>
    %20 = tpu.matmul %18, %19, %cst_11 {dimension_numbers = #tpu.dot_dimension_numbers<[1], [0], [0], [1], [0, 0, 1, 1], [], []>} : vector<10x16xf32>, vector<16x96xf32>, vector<10x96xf32> -> vector<10x96xf32>
    %21 = arith.addf %17, %20 : vector<10x96xf32>
    %22 = vector.extract_strided_slice %10 {offsets = [0, 0], sizes = [1, 96], strides = [1, 1]} : vector<3x96xf32> to vector<1x96xf32>
    %23 = vector.broadcast %22 : vector<1x96xf32> to vector<10x96xf32>
    %24 = arith.addf %21, %23 : vector<10x96xf32>
    %cst_12 = arith.constant 0.000000e+00 : f32
    %25 = vector.broadcast %cst_12 : f32 to vector<10x96xf32>
    %26 = arith.maximumf %24, %25 : vector<10x96xf32>
    %cst_13 = arith.constant dense<0xFF800000> : vector<96xf32>
    %27 = vector.multi_reduction <maximumf>, %26, %cst_13 [0] : vector<10x96xf32> to vector<96xf32>
    %28 = vector.shape_cast %27 : vector<96xf32> to vector<1x96xf32>
    %29 = vector.extract_strided_slice %8 {offsets = [0, 0], sizes = [9, 16], strides = [1, 1]} : vector<24x16xf32> to vector<9x16xf32>
    %30 = vector.extract_strided_slice %9 {offsets = [48, 0], sizes = [16, 96], strides = [1, 1]} : vector<192x96xf32> to vector<16x96xf32>
    %cst_14 = arith.constant dense<0.000000e+00> : vector<9x96xf32>
    %31 = tpu.matmul %29, %30, %cst_14 {dimension_numbers = #tpu.dot_dimension_numbers<[1], [0], [0], [1], [0, 0, 1, 1], [], []>} : vector<9x16xf32>, vector<16x96xf32>, vector<9x96xf32> -> vector<9x96xf32>
    %32 = vector.extract_strided_slice %8 {offsets = [1, 0], sizes = [9, 16], strides = [1, 1]} : vector<24x16xf32> to vector<9x16xf32>
    %33 = vector.extract_strided_slice %9 {offsets = [64, 0], sizes = [16, 96], strides = [1, 1]} : vector<192x96xf32> to vector<16x96xf32>
    %cst_15 = arith.constant dense<0.000000e+00> : vector<9x96xf32>
    %34 = tpu.matmul %32, %33, %cst_15 {dimension_numbers = #tpu.dot_dimension_numbers<[1], [0], [0], [1], [0, 0, 1, 1], [], []>} : vector<9x16xf32>, vector<16x96xf32>, vector<9x96xf32> -> vector<9x96xf32>
    %35 = arith.addf %31, %34 : vector<9x96xf32>
    %36 = vector.extract_strided_slice %8 {offsets = [2, 0], sizes = [9, 16], strides = [1, 1]} : vector<24x16xf32> to vector<9x16xf32>
    %37 = vector.extract_strided_slice %9 {offsets = [80, 0], sizes = [16, 96], strides = [1, 1]} : vector<192x96xf32> to vector<16x96xf32>
    %cst_16 = arith.constant dense<0.000000e+00> : vector<9x96xf32>
    %38 = tpu.matmul %36, %37, %cst_16 {dimension_numbers = #tpu.dot_dimension_numbers<[1], [0], [0], [1], [0, 0, 1, 1], [], []>} : vector<9x16xf32>, vector<16x96xf32>, vector<9x96xf32> -> vector<9x96xf32>
    %39 = arith.addf %35, %38 : vector<9x96xf32>
    %40 = vector.extract_strided_slice %8 {offsets = [3, 0], sizes = [9, 16], strides = [1, 1]} : vector<24x16xf32> to vector<9x16xf32>
    %41 = vector.extract_strided_slice %9 {offsets = [96, 0], sizes = [16, 96], strides = [1, 1]} : vector<192x96xf32> to vector<16x96xf32>
    %cst_17 = arith.constant dense<0.000000e+00> : vector<9x96xf32>
    %42 = tpu.matmul %40, %41, %cst_17 {dimension_numbers = #tpu.dot_dimension_numbers<[1], [0], [0], [1], [0, 0, 1, 1], [], []>} : vector<9x16xf32>, vector<16x96xf32>, vector<9x96xf32> -> vector<9x96xf32>
    %43 = arith.addf %39, %42 : vector<9x96xf32>
    %44 = vector.extract_strided_slice %10 {offsets = [1, 0], sizes = [1, 96], strides = [1, 1]} : vector<3x96xf32> to vector<1x96xf32>
    %45 = vector.broadcast %44 : vector<1x96xf32> to vector<9x96xf32>
    %46 = arith.addf %43, %45 : vector<9x96xf32>
    %cst_18 = arith.constant 0.000000e+00 : f32
    %47 = vector.broadcast %cst_18 : f32 to vector<9x96xf32>
    %48 = arith.maximumf %46, %47 : vector<9x96xf32>
    %cst_19 = arith.constant dense<0xFF800000> : vector<96xf32>
    %49 = vector.multi_reduction <maximumf>, %48, %cst_19 [0] : vector<9x96xf32> to vector<96xf32>
    %50 = vector.shape_cast %49 : vector<96xf32> to vector<1x96xf32>
    %51 = arith.addf %28, %50 : vector<1x96xf32>
    %52 = vector.extract_strided_slice %8 {offsets = [0, 0], sizes = [8, 16], strides = [1, 1]} : vector<24x16xf32> to vector<8x16xf32>
    %53 = vector.extract_strided_slice %9 {offsets = [112, 0], sizes = [16, 96], strides = [1, 1]} : vector<192x96xf32> to vector<16x96xf32>
    %cst_20 = arith.constant dense<0.000000e+00> : vector<8x96xf32>
    %54 = tpu.matmul %52, %53, %cst_20 {dimension_numbers = #tpu.dot_dimension_numbers<[1], [0], [0], [1], [0, 0, 1, 1], [], []>} : vector<8x16xf32>, vector<16x96xf32>, vector<8x96xf32> -> vector<8x96xf32>
    %55 = vector.extract_strided_slice %8 {offsets = [1, 0], sizes = [8, 16], strides = [1, 1]} : vector<24x16xf32> to vector<8x16xf32>
    %56 = vector.extract_strided_slice %9 {offsets = [128, 0], sizes = [16, 96], strides = [1, 1]} : vector<192x96xf32> to vector<16x96xf32>
    %cst_21 = arith.constant dense<0.000000e+00> : vector<8x96xf32>
    %57 = tpu.matmul %55, %56, %cst_21 {dimension_numbers = #tpu.dot_dimension_numbers<[1], [0], [0], [1], [0, 0, 1, 1], [], []>} : vector<8x16xf32>, vector<16x96xf32>, vector<8x96xf32> -> vector<8x96xf32>
    %58 = arith.addf %54, %57 : vector<8x96xf32>
    %59 = vector.extract_strided_slice %8 {offsets = [2, 0], sizes = [8, 16], strides = [1, 1]} : vector<24x16xf32> to vector<8x16xf32>
    %60 = vector.extract_strided_slice %9 {offsets = [144, 0], sizes = [16, 96], strides = [1, 1]} : vector<192x96xf32> to vector<16x96xf32>
    %cst_22 = arith.constant dense<0.000000e+00> : vector<8x96xf32>
    %61 = tpu.matmul %59, %60, %cst_22 {dimension_numbers = #tpu.dot_dimension_numbers<[1], [0], [0], [1], [0, 0, 1, 1], [], []>} : vector<8x16xf32>, vector<16x96xf32>, vector<8x96xf32> -> vector<8x96xf32>
    %62 = arith.addf %58, %61 : vector<8x96xf32>
    %63 = vector.extract_strided_slice %8 {offsets = [3, 0], sizes = [8, 16], strides = [1, 1]} : vector<24x16xf32> to vector<8x16xf32>
    %64 = vector.extract_strided_slice %9 {offsets = [160, 0], sizes = [16, 96], strides = [1, 1]} : vector<192x96xf32> to vector<16x96xf32>
    %cst_23 = arith.constant dense<0.000000e+00> : vector<8x96xf32>
    %65 = tpu.matmul %63, %64, %cst_23 {dimension_numbers = #tpu.dot_dimension_numbers<[1], [0], [0], [1], [0, 0, 1, 1], [], []>} : vector<8x16xf32>, vector<16x96xf32>, vector<8x96xf32> -> vector<8x96xf32>
    %66 = arith.addf %62, %65 : vector<8x96xf32>
    %67 = vector.extract_strided_slice %8 {offsets = [4, 0], sizes = [8, 16], strides = [1, 1]} : vector<24x16xf32> to vector<8x16xf32>
    %68 = vector.extract_strided_slice %9 {offsets = [176, 0], sizes = [16, 96], strides = [1, 1]} : vector<192x96xf32> to vector<16x96xf32>
    %cst_24 = arith.constant dense<0.000000e+00> : vector<8x96xf32>
    %69 = tpu.matmul %67, %68, %cst_24 {dimension_numbers = #tpu.dot_dimension_numbers<[1], [0], [0], [1], [0, 0, 1, 1], [], []>} : vector<8x16xf32>, vector<16x96xf32>, vector<8x96xf32> -> vector<8x96xf32>
    %70 = arith.addf %66, %69 : vector<8x96xf32>
    %71 = vector.extract_strided_slice %10 {offsets = [2, 0], sizes = [1, 96], strides = [1, 1]} : vector<3x96xf32> to vector<1x96xf32>
    %72 = vector.broadcast %71 : vector<1x96xf32> to vector<8x96xf32>
    %73 = arith.addf %70, %72 : vector<8x96xf32>
    %cst_25 = arith.constant 0.000000e+00 : f32
    %74 = vector.broadcast %cst_25 : f32 to vector<8x96xf32>
    %75 = arith.maximumf %73, %74 : vector<8x96xf32>
    %cst_26 = arith.constant dense<0xFF800000> : vector<96xf32>
    %76 = vector.multi_reduction <maximumf>, %75, %cst_26 [0] : vector<8x96xf32> to vector<96xf32>
    %77 = vector.shape_cast %76 : vector<96xf32> to vector<1x96xf32>
    %78 = arith.addf %51, %77 : vector<1x96xf32>
    %79 = vector.extract_strided_slice %8 {offsets = [12, 0], sizes = [10, 16], strides = [1, 1]} : vector<24x16xf32> to vector<10x16xf32>
    %80 = vector.extract_strided_slice %9 {offsets = [0, 0], sizes = [16, 96], strides = [1, 1]} : vector<192x96xf32> to vector<16x96xf32>
    %cst_27 = arith.constant dense<0.000000e+00> : vector<10x96xf32>
    %81 = tpu.matmul %79, %80, %cst_27 {dimension_numbers = #tpu.dot_dimension_numbers<[1], [0], [0], [1], [0, 0, 1, 1], [], []>} : vector<10x16xf32>, vector<16x96xf32>, vector<10x96xf32> -> vector<10x96xf32>
    %82 = vector.extract_strided_slice %8 {offsets = [13, 0], sizes = [10, 16], strides = [1, 1]} : vector<24x16xf32> to vector<10x16xf32>
    %83 = vector.extract_strided_slice %9 {offsets = [16, 0], sizes = [16, 96], strides = [1, 1]} : vector<192x96xf32> to vector<16x96xf32>
    %cst_28 = arith.constant dense<0.000000e+00> : vector<10x96xf32>
    %84 = tpu.matmul %82, %83, %cst_28 {dimension_numbers = #tpu.dot_dimension_numbers<[1], [0], [0], [1], [0, 0, 1, 1], [], []>} : vector<10x16xf32>, vector<16x96xf32>, vector<10x96xf32> -> vector<10x96xf32>
    %85 = arith.addf %81, %84 : vector<10x96xf32>
    %86 = vector.extract_strided_slice %8 {offsets = [14, 0], sizes = [10, 16], strides = [1, 1]} : vector<24x16xf32> to vector<10x16xf32>
    %87 = vector.extract_strided_slice %9 {offsets = [32, 0], sizes = [16, 96], strides = [1, 1]} : vector<192x96xf32> to vector<16x96xf32>
    %cst_29 = arith.constant dense<0.000000e+00> : vector<10x96xf32>
    %88 = tpu.matmul %86, %87, %cst_29 {dimension_numbers = #tpu.dot_dimension_numbers<[1], [0], [0], [1], [0, 0, 1, 1], [], []>} : vector<10x16xf32>, vector<16x96xf32>, vector<10x96xf32> -> vector<10x96xf32>
    %89 = arith.addf %85, %88 : vector<10x96xf32>
    %90 = vector.extract_strided_slice %10 {offsets = [0, 0], sizes = [1, 96], strides = [1, 1]} : vector<3x96xf32> to vector<1x96xf32>
    %91 = vector.broadcast %90 : vector<1x96xf32> to vector<10x96xf32>
    %92 = arith.addf %89, %91 : vector<10x96xf32>
    %cst_30 = arith.constant 0.000000e+00 : f32
    %93 = vector.broadcast %cst_30 : f32 to vector<10x96xf32>
    %94 = arith.maximumf %92, %93 : vector<10x96xf32>
    %cst_31 = arith.constant dense<0xFF800000> : vector<96xf32>
    %95 = vector.multi_reduction <maximumf>, %94, %cst_31 [0] : vector<10x96xf32> to vector<96xf32>
    %96 = vector.shape_cast %95 : vector<96xf32> to vector<1x96xf32>
    %97 = vector.extract_strided_slice %8 {offsets = [12, 0], sizes = [9, 16], strides = [1, 1]} : vector<24x16xf32> to vector<9x16xf32>
    %98 = vector.extract_strided_slice %9 {offsets = [48, 0], sizes = [16, 96], strides = [1, 1]} : vector<192x96xf32> to vector<16x96xf32>
    %cst_32 = arith.constant dense<0.000000e+00> : vector<9x96xf32>
    %99 = tpu.matmul %97, %98, %cst_32 {dimension_numbers = #tpu.dot_dimension_numbers<[1], [0], [0], [1], [0, 0, 1, 1], [], []>} : vector<9x16xf32>, vector<16x96xf32>, vector<9x96xf32> -> vector<9x96xf32>
    %100 = vector.extract_strided_slice %8 {offsets = [13, 0], sizes = [9, 16], strides = [1, 1]} : vector<24x16xf32> to vector<9x16xf32>
    %101 = vector.extract_strided_slice %9 {offsets = [64, 0], sizes = [16, 96], strides = [1, 1]} : vector<192x96xf32> to vector<16x96xf32>
    %cst_33 = arith.constant dense<0.000000e+00> : vector<9x96xf32>
    %102 = tpu.matmul %100, %101, %cst_33 {dimension_numbers = #tpu.dot_dimension_numbers<[1], [0], [0], [1], [0, 0, 1, 1], [], []>} : vector<9x16xf32>, vector<16x96xf32>, vector<9x96xf32> -> vector<9x96xf32>
    %103 = arith.addf %99, %102 : vector<9x96xf32>
    %104 = vector.extract_strided_slice %8 {offsets = [14, 0], sizes = [9, 16], strides = [1, 1]} : vector<24x16xf32> to vector<9x16xf32>
    %105 = vector.extract_strided_slice %9 {offsets = [80, 0], sizes = [16, 96], strides = [1, 1]} : vector<192x96xf32> to vector<16x96xf32>
    %cst_34 = arith.constant dense<0.000000e+00> : vector<9x96xf32>
    %106 = tpu.matmul %104, %105, %cst_34 {dimension_numbers = #tpu.dot_dimension_numbers<[1], [0], [0], [1], [0, 0, 1, 1], [], []>} : vector<9x16xf32>, vector<16x96xf32>, vector<9x96xf32> -> vector<9x96xf32>
    %107 = arith.addf %103, %106 : vector<9x96xf32>
    %108 = vector.extract_strided_slice %8 {offsets = [15, 0], sizes = [9, 16], strides = [1, 1]} : vector<24x16xf32> to vector<9x16xf32>
    %109 = vector.extract_strided_slice %9 {offsets = [96, 0], sizes = [16, 96], strides = [1, 1]} : vector<192x96xf32> to vector<16x96xf32>
    %cst_35 = arith.constant dense<0.000000e+00> : vector<9x96xf32>
    %110 = tpu.matmul %108, %109, %cst_35 {dimension_numbers = #tpu.dot_dimension_numbers<[1], [0], [0], [1], [0, 0, 1, 1], [], []>} : vector<9x16xf32>, vector<16x96xf32>, vector<9x96xf32> -> vector<9x96xf32>
    %111 = arith.addf %107, %110 : vector<9x96xf32>
    %112 = vector.extract_strided_slice %10 {offsets = [1, 0], sizes = [1, 96], strides = [1, 1]} : vector<3x96xf32> to vector<1x96xf32>
    %113 = vector.broadcast %112 : vector<1x96xf32> to vector<9x96xf32>
    %114 = arith.addf %111, %113 : vector<9x96xf32>
    %cst_36 = arith.constant 0.000000e+00 : f32
    %115 = vector.broadcast %cst_36 : f32 to vector<9x96xf32>
    %116 = arith.maximumf %114, %115 : vector<9x96xf32>
    %cst_37 = arith.constant dense<0xFF800000> : vector<96xf32>
    %117 = vector.multi_reduction <maximumf>, %116, %cst_37 [0] : vector<9x96xf32> to vector<96xf32>
    %118 = vector.shape_cast %117 : vector<96xf32> to vector<1x96xf32>
    %119 = arith.addf %96, %118 : vector<1x96xf32>
    %120 = vector.extract_strided_slice %8 {offsets = [12, 0], sizes = [8, 16], strides = [1, 1]} : vector<24x16xf32> to vector<8x16xf32>
    %121 = vector.extract_strided_slice %9 {offsets = [112, 0], sizes = [16, 96], strides = [1, 1]} : vector<192x96xf32> to vector<16x96xf32>
    %cst_38 = arith.constant dense<0.000000e+00> : vector<8x96xf32>
    %122 = tpu.matmul %120, %121, %cst_38 {dimension_numbers = #tpu.dot_dimension_numbers<[1], [0], [0], [1], [0, 0, 1, 1], [], []>} : vector<8x16xf32>, vector<16x96xf32>, vector<8x96xf32> -> vector<8x96xf32>
    %123 = vector.extract_strided_slice %8 {offsets = [13, 0], sizes = [8, 16], strides = [1, 1]} : vector<24x16xf32> to vector<8x16xf32>
    %124 = vector.extract_strided_slice %9 {offsets = [128, 0], sizes = [16, 96], strides = [1, 1]} : vector<192x96xf32> to vector<16x96xf32>
    %cst_39 = arith.constant dense<0.000000e+00> : vector<8x96xf32>
    %125 = tpu.matmul %123, %124, %cst_39 {dimension_numbers = #tpu.dot_dimension_numbers<[1], [0], [0], [1], [0, 0, 1, 1], [], []>} : vector<8x16xf32>, vector<16x96xf32>, vector<8x96xf32> -> vector<8x96xf32>
    %126 = arith.addf %122, %125 : vector<8x96xf32>
    %127 = vector.extract_strided_slice %8 {offsets = [14, 0], sizes = [8, 16], strides = [1, 1]} : vector<24x16xf32> to vector<8x16xf32>
    %128 = vector.extract_strided_slice %9 {offsets = [144, 0], sizes = [16, 96], strides = [1, 1]} : vector<192x96xf32> to vector<16x96xf32>
    %cst_40 = arith.constant dense<0.000000e+00> : vector<8x96xf32>
    %129 = tpu.matmul %127, %128, %cst_40 {dimension_numbers = #tpu.dot_dimension_numbers<[1], [0], [0], [1], [0, 0, 1, 1], [], []>} : vector<8x16xf32>, vector<16x96xf32>, vector<8x96xf32> -> vector<8x96xf32>
    %130 = arith.addf %126, %129 : vector<8x96xf32>
    %131 = vector.extract_strided_slice %8 {offsets = [15, 0], sizes = [8, 16], strides = [1, 1]} : vector<24x16xf32> to vector<8x16xf32>
    %132 = vector.extract_strided_slice %9 {offsets = [160, 0], sizes = [16, 96], strides = [1, 1]} : vector<192x96xf32> to vector<16x96xf32>
    %cst_41 = arith.constant dense<0.000000e+00> : vector<8x96xf32>
    %133 = tpu.matmul %131, %132, %cst_41 {dimension_numbers = #tpu.dot_dimension_numbers<[1], [0], [0], [1], [0, 0, 1, 1], [], []>} : vector<8x16xf32>, vector<16x96xf32>, vector<8x96xf32> -> vector<8x96xf32>
    %134 = arith.addf %130, %133 : vector<8x96xf32>
    %135 = vector.extract_strided_slice %8 {offsets = [16, 0], sizes = [8, 16], strides = [1, 1]} : vector<24x16xf32> to vector<8x16xf32>
    %136 = vector.extract_strided_slice %9 {offsets = [176, 0], sizes = [16, 96], strides = [1, 1]} : vector<192x96xf32> to vector<16x96xf32>
    %cst_42 = arith.constant dense<0.000000e+00> : vector<8x96xf32>
    %137 = tpu.matmul %135, %136, %cst_42 {dimension_numbers = #tpu.dot_dimension_numbers<[1], [0], [0], [1], [0, 0, 1, 1], [], []>} : vector<8x16xf32>, vector<16x96xf32>, vector<8x96xf32> -> vector<8x96xf32>
    %138 = arith.addf %134, %137 : vector<8x96xf32>
    %139 = vector.extract_strided_slice %10 {offsets = [2, 0], sizes = [1, 96], strides = [1, 1]} : vector<3x96xf32> to vector<1x96xf32>
    %140 = vector.broadcast %139 : vector<1x96xf32> to vector<8x96xf32>
    %141 = arith.addf %138, %140 : vector<8x96xf32>
    %cst_43 = arith.constant 0.000000e+00 : f32
    %142 = vector.broadcast %cst_43 : f32 to vector<8x96xf32>
    %143 = arith.maximumf %141, %142 : vector<8x96xf32>
    %cst_44 = arith.constant dense<0xFF800000> : vector<96xf32>
    %144 = vector.multi_reduction <maximumf>, %143, %cst_44 [0] : vector<8x96xf32> to vector<96xf32>
    %145 = vector.shape_cast %144 : vector<96xf32> to vector<1x96xf32>
    %146 = arith.addf %119, %145 : vector<1x96xf32>
    %147 = tpu.concatenate %78, %146 in 0 : vector<1x96xf32>, vector<1x96xf32> -> vector<2x96xf32>
    %c0_45 = arith.constant 0 : index
    %c0_46 = arith.constant 0 : index
    %148 = vector.load %arg7[%c0_45, %c0_46] : memref<2x96xf32, #tpu.memory_space<vmem>>, vector<2x96xf32>
    tpu.vector_store %arg7[%c0_45, %c0_46], %147 {strides = array<i32>} : memref<2x96xf32, #tpu.memory_space<vmem>>, vector<2x96xf32>,
    %c0_47 = arith.constant 0 : index
    %c0_48 = arith.constant 0 : index
    %149 = vector.load %arg4[%c0_47, %c0_48] : memref<96x2xf32, #tpu.memory_space<vmem>>, vector<96x2xf32>
    %cst_49 = arith.constant dense<0.000000e+00> : vector<2x2xf32>
    %150 = tpu.matmul %147, %149, %cst_49 {dimension_numbers = #tpu.dot_dimension_numbers<[1], [0], [0], [1], [0, 0, 1, 1], [], []>} : vector<2x96xf32>, vector<96x2xf32>, vector<2x2xf32> -> vector<2x2xf32>
    %c0_50 = arith.constant 0 : index
    %c0_51 = arith.constant 0 : index
    %151 = vector.load %arg5[%c0_50, %c0_51] : memref<1x2xf32, #tpu.memory_space<vmem>>, vector<1x2xf32>
    %152 = vector.broadcast %151 : vector<1x2xf32> to vector<2x2xf32>
    %153 = arith.addf %150, %152 : vector<2x2xf32>
    %cst_52 = arith.constant dense<0xFF800000> : vector<2xf32>
    %154 = vector.multi_reduction <maximumf>, %153, %cst_52 [1] : vector<2x2xf32> to vector<2xf32>
    %155 = vector.shape_cast %154 : vector<2xf32> to vector<2x1xf32>
    %156 = vector.broadcast %155 : vector<2x1xf32> to vector<2x2xf32>
    %157 = arith.subf %153, %156 : vector<2x2xf32>
    %158 = math.exp %157 : vector<2x2xf32>
    %cst_53 = arith.constant dense<0.000000e+00> : vector<2xf32>
    %159 = vector.multi_reduction <add>, %158, %cst_53 [1] : vector<2x2xf32> to vector<2xf32>
    %160 = vector.shape_cast %159 : vector<2xf32> to vector<2x1xf32>
    %161 = tpu.reciprocal %160 {approx = true} : vector<2x1xf32> -> vector<2x1xf32>
    %162 = arith.mulf %160, %161 : vector<2x1xf32>
    %cst_54 = arith.constant 2.000000e+00 : f32
    %163 = vector.broadcast %cst_54 : f32 to vector<2x1xf32>
    %164 = arith.subf %163, %162 : vector<2x1xf32>
    %165 = arith.mulf %161, %164 : vector<2x1xf32>
    %166 = vector.broadcast %165 : vector<2x1xf32> to vector<2x2xf32>
    %167 = arith.mulf %158, %166 : vector<2x2xf32>
    %c0_55 = arith.constant 0 : index
    %c0_56 = arith.constant 0 : index
    %168 = vector.load %arg6[%c0_55, %c0_56] : memref<2x2xf32, #tpu.memory_space<vmem>>, vector<2x2xf32>
    tpu.vector_store %arg6[%c0_55, %c0_56], %167 {strides = array<i32>} : memref<2x2xf32, #tpu.memory_space<vmem>>, vector<2x2xf32>,
    return
  }
}

</mosaic_0001>

<bundles_post_ra>
// kernel: cnn_forward.1
= control target key start
LH: loop header
LB: loop body
LE: loop exit
PB: predicated region body
PF: predicated region fallthrough
CT: control target
= control target key end

     0   :  { %13 = vsyncpa [#allocation3], 0  ;;  %v2809_v2 = vmov 0   ;;  %v2810_v9 = vmov 0.0|0.0   ;;  %s3264_s0 = inlined_call_operand.vmem [shape: s32[24,1], index: 0, kind: input, shape index: {}]   ;;  %s3265_s1 = inlined_call_operand.vmem [shape: f32[50,16], index: 1, kind: input, shape index: {}]   ;;  %s3266_s2 = inlined_call_operand.vmem [shape: f32[192,96], index: 2, kind: input, shape index: {}]   ;;  %s3267_s3 = inlined_call_operand.vmem [shape: f32[3,96], index: 3, kind: input, shape index: {}]   ;;  %s3268_s4 = inlined_call_operand.vmem [shape: f32[96,2], index: 4, kind: input, shape index: {}]   ;;  %s3269_s5 = inlined_call_operand.vmem [shape: f32[1,2], index: 5, kind: input, shape index: {}]   ;;  %s3270_s6 = inlined_call_operand.hbm [shape: f32[2,2], index: 6, kind: output, shape index: {0}]   ;;  %s3271_s7 = inlined_call_operand.hbm [shape: f32[2,96], index: 7, kind: output, shape index: {1}]  }
   0x1   :  { %v27_v0 = vld [vmem:[%s3264_s0] sm:$0xff]  ;;  %v29_v1 = vld [vmem:[%s3264_s0 + $0x10] sm:$0xff]  ;;  %2755 = vset.pattern.permute.xlu0 %v2809_v2  ;;  %2756 = vset.pattern.permute.xlu1 %v2809_v2  ;;  %v48_v4 = vld [vmem:[%s3265_s1 + $0x8] sm:$0xff] }
   0x2   :  { %v47_v3 = vld [vmem:[%s3265_s1] sm:$0xff]  ;;  %v49_v5 = vld [vmem:[%s3265_s1 + $0x10] sm:$0xff]  ;;  %33 = vperm.xlu0 %2755, %v27_v0   ;;  %39 = vperm.xlu1 %2756, %v29_v1   ;;  %v50_v7 = vld [vmem:[%s3265_s1 + $0x18] sm:$0xff] }
   0x3   :  { %v2609_v6 = vpack.c.bf16 %v48_v4, %v47_v3  ;;  %v28_v8 = vld [vmem:[%s3264_s0 + $0x8] sm:$0xff]  ;;  %2608 = vmatprep.subr.bf16.mxu0 %v2810_v9  ;;  %2721 = vmatprep.subr.bf16.mxu1 %v2810_v9 }
   0x4   :  { %14 = vsyncpa [#allocation5], 0  ;;  %v2612_v10 = vpack.c.bf16 %v50_v7, %v49_v5  ;;  %v51_v11 = vld [vmem:[%s3265_s1 + $0x20] sm:$0xff]  ;;  %v52_v12 = vld [vmem:[%s3265_s1 + $0x28] sm:$0xff]  ;;  %vm2811_vm0 = vmmov 0   ;;  %v2812_v13 = vmov 0.0   ;;  %v30_v16 = vlaneseq }
   0x5   :  { %2610 = vmatpush3.bf16.msra.mxu0 %v2609_v6  ;;  %2725 = vmatpush3.bf16.msra.mxu1 %v2609_v6  ;;  %v2615_v14 = vpack.c.bf16 %v52_v12, %v51_v11  ;;  %v53_v15 = vld [vmem:[%s3265_s1 + $0x30] sm:$0x3]  ;;  %vm64_vm1 = vcmask 1041408   ;;  %vm54_vm2 = vcmask 408576   ;;  %v151_v25 = vld [vmem:[%s3266_s2 + $0x18] sm:$0xff]  ;;  %v164_v27 = vld [vmem:[%s3266_s2 + $0x80] sm:$0xff] }
   0x6   :  { %2611 = vmatprep.subr.bf16.mxu0 %v2810_v9  ;;  %2722 = vmatprep.subr.bf16.mxu1 %v2810_v9  ;;  %v31_v17 = vand.u32 127, %v30_v16  ;;  %v150_v24 = vld [vmem:[%s3266_s2 + $0x10] sm:$0xff]  ;;  %v165_v28 = vld [vmem:[%s3266_s2 + $0x88] sm:$0xff]  ;;  %v148_v30 = vld [vmem:[%s3266_s2] sm:$0xff]  ;;  %vm175_vm6 = vcmask 1046528   ;;  %vm179_vm7 = vcmask 130048  }
   0x7   :  { %36 = vperm.xlu0 %2755, %v28_v8   ;;  %2404 = vmatprep.mubr.msk.f32.mxu0 %vm2811_vm0, %v2812_v13  ;;  %v2914_v26 = vpack.c.bf16 %v151_v25, %v150_v24  ;;  %v2923_v29 = vpack.c.bf16 %v165_v28, %v164_v27  ;;  %v149_v31 = vld [vmem:[%s3266_s2 + $0x8] sm:$0xff]  ;;  %v162_v34 = vld [vmem:[%s3266_s2 + $0x70] sm:$0xff]  ;;  %v163_v35 = vld [vmem:[%s3266_s2 + $0x78] sm:$0xff]  ;;  %vm669_vm8 = vcmask 1044480   ;;  %vm338_vm9 = vcmask 1045504  }
   0x8   :  { %2407 = vmatprep.mubr.msk.f32.mxu1 %vm2811_vm0, %v2812_v13  ;;  %v2934_v32 = vpack.c.bf16 %v149_v31, %v148_v30  ;;  %v2945_v37 = vpack.c.bf16 %v163_v35, %v162_v34  ;;  %v168_v38 = vld [vmem:[%s3266_s2 + $0xa0] sm:$0xff]  ;;  %v169_v39 = vld [vmem:[%s3266_s2 + $0xa8] sm:$0xff]  ;;  %vm1055_vm10 = vcmask 1043456   ;;  %vm1147_vm11 = vcmask 1042432   ;;  %v154_v11 = vld [vmem:[%s3266_s2 + $0x30] sm:$0xff] }
   0x9   :  { %2613 = vmatpush3.bf16.msra.mxu0 %v2612_v10  ;;  %2726 = vmatpush3.bf16.msra.mxu1 %v2612_v10  ;;  %v152_v42 = vld [vmem:[%s3266_s2 + $0x20] sm:$0xff]  ;;  %v153_v46 = vld [vmem:[%s3266_s2 + $0x28] sm:$0xff]  ;;  %v2971_v50 = vpack.c.bf16 %v169_v39, %v168_v38  ;;  %vm1635_vm12 = vcmask 1040384   ;;  %v155_v12 = vld [vmem:[%s3266_s2 + $0x38] sm:$0xff]  ;;  %vm433_vm13 = vcmask 779264   ;;  %vm431_vm14 = vcmask 785408  }
   0xa   :  { %2614 = vmatprep.subr.bf16.mxu0 %v2810_v9  ;;  %2723 = vmatprep.subr.bf16.mxu1 %v2810_v9  ;;  %v2625_v57 = vpack.c.bf16 %v153_v46, %v152_v42  ;;  %v156_v6 = vld [vmem:[%s3266_s2 + $0x40] sm:$0xff]  ;;  %v157_v7 = vld [vmem:[%s3266_s2 + $0x48] sm:$0xff]  ;;  %v170_v25 = vld [vmem:[%s3266_s2 + $0xb0] sm:$0xff]  ;;  %vm763_vm15 = vcmask 778240  }
   0xb   :  { %v3043_v10 = vpack.c.bf16 %v157_v7, %v156_v6  ;;  %v2101_v28 = vld [vmem:[%s3268_s4] sm:$0xff]  ;;  %v2103_v31 = vld [vmem:[%s3268_s4 + $0x10] sm:$0xff]  ;;  %v2106_v34 = vld [vmem:[%s3268_s4 + $0x28] sm:$0xff] }
   0xc   :  { %v2109_v39 = vld [vmem:[%s3268_s4 + $0x40] sm:$0xff]  ;;  %v2111_v42 = vld [vmem:[%s3268_s4 + $0x50] sm:$0xff] }
   0xd   :  { %2616 = vmatpush3.bf16.msra.mxu0 %v2615_v14  ;;  %2727 = vmatpush3.bf16.msra.mxu1 %v2615_v14  ;;  %v2633_v14 = vpack.c.bf16 %v155_v12, %v154_v11 }
   0xe   :  { %2402 = vmatprep.subr.mxu0 %v2812_v13  ;;  %2724 = vmatprep.subr.mxu1 %v2812_v13 }
  0x11   :  { %2403 = vmatpush3.msk.msra.mxu0 %vm64_vm1, %v53_v15  ;;  %2728 = vmatpush3.msk.msra.mxu1 %vm64_vm1, %v53_v15  ;;  %v158_v15 = vld [vmem:[%s3266_s2 + $0x50] sm:$0xff] }
  0x12   :  { %2645 = vmatprep.subr.bf16.mxu0 %v2810_v9  ;;  %2618 = vmatprep.subr.bf16.mxu1 %v2914_v26 }
  0x81   :  { %v34_v18 = vpop.permute.xlu0 %33  ;;  %v40_v20 = vpop.permute.xlu1 %39 }
  0x82   :  { %vm41_vm3 = vcmp.eq.s32.totalorder %v31_v17, %v34_v18  ;;  %vm43_vm5 = vcmp.eq.s32.totalorder %v31_v17, %v40_v20  ;;  %v161_v20 = vld [vmem:[%s3266_s2 + $0x68] sm:$0xff] }
  0x83   :  { %v44_v19 = vsel %vm41_vm3, 1.0, %v2812_v13  ;;  %v46_v23 = vsel %vm43_vm5, 1.0, %v2812_v13 }
  0x84   :  { %2405 = vmatmul.mubr.msk.f32.vlgmr.msra.gmra.mrb[0].mxu0 %vm54_vm2, %v44_v19  ;;  %v160_v19 = vld [vmem:[%s3266_s2 + $0x60] sm:$0xff] }
  0x85   :  { %2466 = vmatprep.mubr.msk.f32.mxu0 %vm2811_vm0, %v2812_v13  ;;  %2647 = vmatpush3.bf16.msra.mxu0 %v2923_v29 }
  0x86   :  { %v37_v21 = vpop.permute.xlu0 %36  ;;  %2648 = vmatprep.subr.bf16.mxu0 %v2810_v9 }
  0x87   :  { %vm42_vm4 = vcmp.eq.s32.totalorder %v31_v17, %v37_v21  ;;  %v159_v17 = vld [vmem:[%s3266_s2 + $0x58] sm:$0xff]  ;;  %v2641_v21 = vpack.c.bf16 %v161_v20, %v160_v19 }
  0x88   :  { %v45_v22 = vsel %vm42_vm4, 1.0, %v2812_v13  ;;  %v2637_v18 = vpack.c.bf16 %v159_v17, %v158_v15 }
  0x89   :  { %2408 = vmatmul.mubr.msk.f32.vlgmr.msra.gmra.mrb[0].mxu1 %vm54_vm2, %v45_v22  ;;  %v166_v22 = vld [vmem:[%s3266_s2 + $0x90] sm:$0xff] }
  0x8a   :  { %2410 = vmatprep.mubr.msk.f32.mxu1 %vm2811_vm0, %v2812_v13  ;;  %2620 = vmatpush3.bf16.msra.mxu1 %v2914_v26 }
  0x8b   :  { %2622 = vmatprep.subr.bf16.mxu1 %v2934_v32 }
  0x8d   :  { %2411 = vmatmul.mubr.msk.f32.gmra.mrb[2].mxu1 %vm54_vm2, %v46_v23  ;;  %v167_v23 = vld [vmem:[%s3266_s2 + $0x98] sm:$0xff] }
  0x8e   :  { %v2652_v24 = vpack.c.bf16 %v167_v23, %v166_v22 }
 0x157   :  { %v2937_v33 = vpop.f32.mrb[0].mxu0 }
 0x158   :  { %v2406_v36 = vpop.f32.mrb[1].mxu0  ;;  %v176_v41 = vrot.slane %v2937_v33, 1  ;;  %v670_v43 = vrot.slane %v2937_v33, 3  ;;  %v339_v48 = vrot.slane %v2937_v33, 2  ;;  %v1056_v52 = vrot.slane %v2937_v33, 4 }
 0x159   :  { %v2107_v36 = vld [vmem:[%s3268_s4 + $0x30] sm:$0xff] }
 0x15c   :  { %v2953_v40 = vpop.f32.mrb[0].mxu1 }
 0x15d   :  { %v2409_v44 = vpop.f32.mrb[1].mxu1  ;;  %v2961_v45 = vrot.slane %v2953_v40, 1  ;;  %v671_v47 = vrot.slane %v2953_v40, 3  ;;  %v2969_v49 = vrot.slane %v2953_v40, 2  ;;  %v1057_v51 = vrot.slane %v2953_v40, 4 }
 0x15e   :  { %v1148_v58 = vrot.slane %v2953_v40, 5  ;;  %v1311_v59 = vrot.slane %v2953_v40, 6  ;;  %v1636_v2 = vrot.slane %v2953_v40, 7 }
 0x15f   :  { %v178_v53 = vsel %vm175_vm6, %v176_v41, %v2961_v45  ;;  %v2980_v54 = vsel %vm669_vm8, %v670_v43, %v671_v47  ;;  %v2983_v55 = vsel %vm338_vm9, %v339_v48, %v2969_v49  ;;  %v2992_v60 = vsel %vm1055_vm10, %v1056_v52, %v1057_v51  ;;  %v2112_v43 = vld [vmem:[%s3268_s4 + $0x58] sm:$0xff] }
 0x160   :  { %v2985_v56 = vpop.f32.mrb[2].mxu1  ;;  %2417 = vmatprep.mubr.msk.f32.mxu1 %vm179_vm7, %v178_v53  ;;  %2467 = vmatmul.mubr.msk.f32.vlgmr.msra.gmra.mrb[2].mxu0 %vm179_vm7, %v178_v53  ;;  %v2719_v44 = vpack.c.bf16 %v2112_v43, %v2111_v42 }
 0x161   :  { %v1637_v61 = vrot.slane %v2985_v56, 7  ;;  %2418 = vmatmul.mubr.msk.f32.vlgmr.msra.gmra.mrb[4].mxu1 %vm179_vm7, %v2961_v45  ;;  %2650 = vmatpush3.bf16.msra.mxu0 %v2945_v37  ;;  %v2999_v62 = vrot.slane %v2985_v56, 5  ;;  %v3002_v63 = vrot.slane %v2985_v56, 4  ;;  %v3005_v0 = vrot.slane %v2985_v56, 6  ;;  %v2412_v1 = vpop.f32.mrb[3].mxu1 }
 0x162   :  { %2624 = vmatpush3.bf16.msra.mxu1 %v2934_v32  ;;  %2424 = vmatprep.mubr.msk.f32.mxu1 %vm179_vm7, %v2937_v33 }
 0x163   :  { %2473 = vmatprep.mubr.msk.f32.mxu0 %vm2811_vm0, %v2812_v13  ;;  %2654 = vmatprep.subr.bf16.mxu0 %v2810_v9  ;;  %v3016_v3 = vsel %vm1147_vm11, %v1148_v58, %v2999_v62  ;;  %v3020_v4 = vsel %vm1055_vm10, %v1057_v51, %v3002_v63  ;;  %v3024_v5 = vsel %vm64_vm1, %v1311_v59, %v3005_v0 }
 0x164   :  { %2474 = vmatmul.mubr.msk.f32.vlgmr.msra.gmra.mrb[4].mxu0 %vm179_vm7, %v2937_v33  ;;  %2626 = vmatprep.subr.bf16.mxu1 %v2625_v57  ;;  %v3037_v8 = vsel %vm1635_vm12, %v1636_v2, %v1637_v61 }
 0x165   :  { %2656 = vmatpush3.bf16.msra.mxu0 %v2971_v50  ;;  %2487 = vmatprep.mubr.msk.f32.mxu0 %vm2811_vm0, %v2812_v13 }
 0x166   :  { %2661 = vmatprep.subr.bf16.mxu0 %v2914_v26 }
 0x168   :  { %2488 = vmatmul.mubr.msk.f32.vlgmr.msra.gmra.mrb[6].mxu0 %vm179_vm7, %v2980_v54 }
 0x169   :  { %2425 = vmatmul.mubr.msk.f32.vlgmr.msra.gmra.mrb[4].mxu1 %vm179_vm7, %v2953_v40  ;;  %2663 = vmatpush3.bf16.msra.mxu0 %v2914_v26  ;;  %v171_v26 = vld [vmem:[%s3266_s2 + $0xb8] sm:$0xff]  ;;  %s2813_s2 = smov [#allocation4]  }
 0x16a   :  { %2628 = vmatpush3.bf16.msra.mxu1 %v2625_v57  ;;  %2501 = vmatprep.mubr.msk.f32.mxu0 %vm179_vm7, %v3016_v3  ;;  %v2658_v27 = vpack.c.bf16 %v171_v26, %v170_v25  ;;  %s2225_s0 = sshll.u32 %s2813_s2, 4  ;;  %s2226_s0 = int_to_ptr.vmem [resolvable:$true] %s2225_s0 }
 0x16b   :  { %2431 = vmatprep.mubr.msk.f32.mxu1 %vm179_vm7, %v2983_v55  ;;  %2630 = vmatprep.subr.bf16.mxu1 %v3043_v10  ;;  %s2761_s19 = scalar_lea.vmem %s2226_s0, 32  ;;  %p2766_p1 = scmp.lt.s32.totalorder %s2226_s0, %s2226_s0 }
 0x16c   :  { %2502 = vmatmul.mubr.msk.f32.vlgmr.msra.gmra.mrb[8].mxu0 %vm179_vm7, %v2999_v62  ;;  %2665 = vmatprep.subr.bf16.mxu0 %v2934_v32  ;;  %p2762_p0 = scmp.ne.s32.totalorder %s2226_s0, %s2761_s19  ;;  %p2767_p2 = scmp.lt.s32.totalorder %s2761_s19, %s2761_s19 }
 0x16d   :  { %2508 = vmatprep.mubr.msk.f32.mxu0 %vm179_vm7, %v3020_v4  ;;  %2667 = vmatpush3.bf16.msra.mxu0 %v2934_v32 }
 0x16e   :  { %2669 = vmatprep.subr.bf16.mxu0 %v2625_v57  ;;  %p2768_p3 = por %p2767_p2, %p2766_p1 }
 0x170   :  { %p2769_p4 = pnand %p2768_p3, %p2762_p0 }
 0x171   :  { %2432 = vmatmul.mubr.msk.f32.vlgmr.msra.gmra.mrb[4].mxu1 %vm179_vm7, %v2969_v49 }
 0x172   :  { %2632 = vmatpush3.bf16.msra.mxu1 %v3043_v10  ;;  %2438 = vmatprep.mubr.msk.f32.mxu1 %vm179_vm7, %v178_v53  ;;  %v172_v53 = vld [vmem:[%s3267_s3] sm:$0x7] }
 0x173   :  { %2634 = vmatprep.subr.bf16.mxu1 %v2633_v14 }
 0x174   :  { %2509 = vmatmul.mubr.msk.f32.vlgmr.msra.gmra.mrb[8].mxu0 %vm179_vm7, %v3002_v63 }
 0x175   :  { %2439 = vmatmul.mubr.msk.f32.vlgmr.msra.gmra.mrb[6].mxu1 %vm179_vm7, %v2961_v45  ;;  %2515 = vmatprep.mubr.msk.f32.mxu0 %vm179_vm7, %v3024_v5 }
 0x176   :  { %2636 = vmatpush3.bf16.msra.mxu1 %v2633_v14  ;;  %2445 = vmatprep.mubr.msk.f32.mxu1 %vm179_vm7, %v2937_v33  ;;  %v2105_v33 = vld [vmem:[%s3268_s4 + $0x20] sm:$0xff] }
 0x177   :  { %2671 = vmatpush3.bf16.msra.mxu0 %v2625_v57  ;;  %2638 = vmatprep.subr.bf16.mxu1 %v2637_v18  ;;  %v2710_v35 = vpack.c.bf16 %v2106_v34, %v2105_v33 }
 0x178   :  { %2688 = vmatprep.subr.bf16.mxu0 %v2810_v9 }
 0x17c   :  { %2516 = vmatmul.mubr.msk.f32.vlgmr.msra.gmra.mrb[8].mxu0 %vm179_vm7, %v3005_v0 }
 0x17d   :  { %2446 = vmatmul.mubr.msk.f32.vlgmr.msra.gmra.mrb[6].mxu1 %vm179_vm7, %v2953_v40  ;;  %2690 = vmatpush3.bf16.msra.mxu0 %v2923_v29  ;;  %v2102_v29 = vld [vmem:[%s3268_s4 + $0x8] sm:$0xff] }
 0x17e   :  { %2640 = vmatpush3.bf16.msra.mxu1 %v2637_v18  ;;  %2452 = vmatprep.mubr.msk.f32.mxu1 %vm179_vm7, %v2983_v55  ;;  %v2704_v30 = vpack.c.bf16 %v2102_v29, %v2101_v28  ;;  %v2110_v40 = vld [vmem:[%s3268_s4 + $0x48] sm:$0xff] }
 0x17f   :  { %2550 = vmatprep.mubr.msk.f32.mxu0 %vm2811_vm0, %v2812_v13  ;;  %2691 = vmatprep.subr.bf16.mxu0 %v2810_v9  ;;  %v2716_v41 = vpack.c.bf16 %v2110_v40, %v2109_v39 }
 0x180   :  { %2551 = vmatmul.mubr.msk.f32.vlgmr.msra.gmra.mrb[10].mxu0 %vm179_vm7, %v3016_v3  ;;  %2642 = vmatprep.subr.bf16.mxu1 %v2641_v21 }
 0x181   :  { %2693 = vmatpush3.bf16.msra.mxu0 %v2945_v37  ;;  %2557 = vmatprep.mubr.msk.f32.mxu0 %vm2811_vm0, %v2812_v13  ;;  %v2108_v37 = vld [vmem:[%s3268_s4 + $0x38] sm:$0xff] }
 0x182   :  { %2697 = vmatprep.subr.bf16.mxu0 %v2810_v9  ;;  %v2713_v38 = vpack.c.bf16 %v2108_v37, %v2107_v36 }
 0x184   :  { %2558 = vmatmul.mubr.msk.f32.vlgmr.msra.gmra.mrb[12].mxu0 %vm179_vm7, %v3020_v4 }
 0x185   :  { %2453 = vmatmul.mubr.msk.f32.vlgmr.msra.gmra.mrb[6].mxu1 %vm179_vm7, %v2969_v49  ;;  %2699 = vmatpush3.bf16.msra.mxu0 %v2971_v50  ;;  %v424_v50 = vshrl.u32 %v30_v16, 7 }
 0x186   :  { %2644 = vmatpush3.bf16.msra.mxu1 %v2641_v21  ;;  %2459 = vmatprep.mubr.msk.f32.mxu1 %vm179_vm7, %v2980_v54 }
 0x187   :  { %2571 = vmatprep.mubr.msk.f32.mxu0 %vm2811_vm0, %v2812_v13  ;;  %2651 = vmatprep.subr.bf16.mxu1 %v2810_v9  ;;  %v756_v15 = vsub.s32 1, %v424_v50 }
 0x188   :  { %2572 = vmatmul.mubr.msk.f32.vlgmr.msra.gmra.mrb[14].mxu0 %vm179_vm7, %v3037_v8  ;;  %2703 = vmatprep.subr.bf16.mxu0 %v2810_v9 }
 0x189   :  { %2605 = vmatprep.mubr.msk.f32.mxu0 %vm2811_vm0, %v2812_v13  ;;  %2705 = vmatpush3.bf16.msra.mxu0 %v2704_v30  ;;  %v757_v19 = vrot.slane %v172_v53, %v756_v15 }
 0x18a   :  { %2706 = vmatprep.subr.bf16.mxu0 %v2810_v9 }
 0x18d   :  { %2460 = vmatmul.mubr.msk.f32.vlgmr.msra.gmra.mrb[6].mxu1 %vm179_vm7, %v671_v47 }
 0x18e   :  { %2653 = vmatpush3.bf16.msra.mxu1 %v2652_v24  ;;  %2480 = vmatprep.mubr.msk.f32.mxu1 %vm2811_vm0, %v2812_v13 }
 0x18f   :  { %2657 = vmatprep.subr.bf16.mxu1 %v2810_v9 }
 0x191   :  { %2481 = vmatmul.mubr.msk.f32.vlgmr.msra.gmra.mrb[8].mxu1 %vm179_vm7, %v2983_v55 }
 0x192   :  { %2659 = vmatpush3.bf16.msra.mxu1 %v2658_v27  ;;  %2494 = vmatprep.mubr.msk.f32.mxu1 %vm2811_vm0, %v2812_v13 }
 0x193   :  { %2673 = vmatprep.subr.bf16.mxu1 %v3043_v10 }
 0x195   :  { %2495 = vmatmul.mubr.msk.f32.vlgmr.msra.gmra.mrb[10].mxu1 %vm179_vm7, %v2992_v60 }
 0x196   :  { %2675 = vmatpush3.bf16.msra.mxu1 %v3043_v10  ;;  %2522 = vmatprep.mubr.msk.f32.mxu1 %vm179_vm7, %v3016_v3 }
 0x197   :  { %2677 = vmatprep.subr.bf16.mxu1 %v2633_v14 }
 0x199   :  { %2523 = vmatmul.mubr.msk.f32.vlgmr.msra.gmra.mrb[12].mxu1 %vm179_vm7, %v2999_v62 }
 0x19a   :  { %2679 = vmatpush3.bf16.msra.mxu1 %v2633_v14  ;;  %2529 = vmatprep.mubr.msk.f32.mxu1 %vm179_vm7, %v3020_v4 }
 0x19b   :  { %2681 = vmatprep.subr.bf16.mxu1 %v2637_v18 }
 0x1a1   :  { %2530 = vmatmul.mubr.msk.f32.vlgmr.msra.gmra.mrb[12].mxu1 %vm179_vm7, %v3002_v63 }
 0x1a2   :  { %2683 = vmatpush3.bf16.msra.mxu1 %v2637_v18  ;;  %2536 = vmatprep.mubr.msk.f32.mxu1 %vm179_vm7, %v3024_v5 }
 0x1a3   :  { %2685 = vmatprep.subr.bf16.mxu1 %v2641_v21 }
 0x1a9   :  { %2537 = vmatmul.mubr.msk.f32.vlgmr.msra.gmra.mrb[12].mxu1 %vm179_vm7, %v3005_v0 }
 0x1aa   :  { %2687 = vmatpush3.bf16.msra.mxu1 %v2641_v21  ;;  %2543 = vmatprep.mubr.msk.f32.mxu1 %vm179_vm7, %v3037_v8 }
 0x1ab   :  { %2694 = vmatprep.subr.bf16.mxu1 %v2810_v9 }
 0x1b1   :  { %2544 = vmatmul.mubr.msk.f32.vlgmr.msra.gmra.mrb[12].mxu1 %vm179_vm7, %v1637_v61 }
 0x1b2   :  { %2696 = vmatpush3.bf16.msra.mxu1 %v2652_v24  ;;  %2564 = vmatprep.mubr.msk.f32.mxu1 %vm2811_vm0, %v2812_v13 }
 0x1b3   :  { %2700 = vmatprep.subr.bf16.mxu1 %v2810_v9 }
 0x1b5   :  { %2565 = vmatmul.mubr.msk.f32.vlgmr.msra.gmra.mrb[14].mxu1 %vm179_vm7, %v3024_v5 }
 0x1b6   :  { %2702 = vmatpush3.bf16.msra.mxu1 %v2658_v27  ;;  %2578 = vmatprep.mubr.msk.f32.mxu1 %vm2811_vm0, %v2812_v13  ;;  %v2104_v13 = vld [vmem:[%s3268_s4 + $0x18] sm:$0xff]  ;;  %v1134_v27 = vsub.s32 2, %v424_v50  ;;  %vm2193_vm0 = vcmask 9216  }
 0x1b7   :  { %v2707_v32 = vpack.c.bf16 %v2104_v13, %v2103_v31 }
 0x1b8   :  { %v1135_v36 = vrot.slane %v172_v53, %v1134_v27 }
 0x1b9   :  { %2579 = vmatmul.mubr.msk.f32.vlgmr.msra.gmra.mrb[16].mxu1 %vm179_vm7, %v2985_v56  ;;  %2708 = vmatpush3.bf16.msra.mxu0 %v2707_v32 }
 0x1ba   :  { %2709 = vmatprep.subr.bf16.mxu0 %v2810_v9 }
 0x1bd   :  { %2711 = vmatpush3.bf16.msra.mxu0 %v2710_v35 }
 0x1be   :  { %2712 = vmatprep.subr.bf16.mxu0 %v2810_v9 }
 0x1c1   :  { %2714 = vmatpush3.bf16.msra.mxu0 %v2713_v38 }
 0x1c2   :  { %2715 = vmatprep.subr.bf16.mxu0 %v2810_v9 }
 0x1c5   :  { %2717 = vmatpush3.bf16.msra.mxu0 %v2716_v41 }
 0x1c6   :  { %2718 = vmatprep.subr.bf16.mxu0 %v2810_v9  ;;  %v425_v9 = vsub.s32 0, %v424_v50 }
 0x1c8   :  { %v426_v54 = vrot.slane %v172_v53, %v425_v9 }
 0x1c9   :  { %2720 = vmatpush3.bf16.msra.mxu0 %v2719_v44 }
 0x233   :  { %v839_v45 = vpop.f32.mrb[2].mxu0 }
 0x234   :  { %v2468_v46 = vpop.f32.mrb[3].mxu0 }
 0x237   :  { %v909_v47 = vpop.f32.mrb[4].mxu0 }
 0x238   :  { %v910_v48 = vadd.f32 %v909_v47, %v839_v45  ;;  %v2475_v49 = vpop.f32.mrb[5].mxu0 }
 0x23b   :  { %v1050_v51 = vpop.f32.mrb[6].mxu0 }
 0x23c   :  { %v2489_v52 = vpop.f32.mrb[7].mxu0 }
 0x244   :  { %v2433_v55 = vpop.f32.mrb[4].mxu1 }
 0x245   :  { %v428_v56 = vadd.f32 %v2433_v55, %v426_v54  ;;  %v412_v57 = vpop.f32.mrb[5].mxu1 }
 0x246   :  { %v427_v58 = vadd.f32 %v426_v54, %v412_v57 }
 0x247   :  { %v430_v59 = vmax.f32 %v428_v56, 0.0 }
 0x248   :  { %v429_v60 = vmax.f32 %v427_v58, 0.0 }
 0x249   :  { %v434_v61 = vsel %vm433_vm13, %v430_v59, -inf }
 0x24a   :  { %v432_v16 = vsel %vm431_vm14, %v429_v60, -inf }
 0x24b   :  { %v435_v62 = vmax.f32 %v432_v16, %v434_v61 }
 0x24d   :  { %v436_v20 = vrot.slane %v435_v62, 4 }
 0x24f   :  { %v2517_v63 = vpop.f32.mrb[8].mxu0  ;;  %v437_v25 = vmax.f32 %v435_v62, %v436_v20 }
 0x250   :  { %v1396_v0 = vadd.f32 %v2517_v63, %v426_v54  ;;  %v1384_v1 = vpop.f32.mrb[9].mxu0 }
 0x251   :  { %v1395_v2 = vadd.f32 %v1384_v1, %v426_v54  ;;  %v438_v33 = vrot.slane %v437_v25, 2 }
 0x252   :  { %v1398_v3 = vmax.f32 %v1396_v0, 0.0 }
 0x253   :  { %v1397_v4 = vmax.f32 %v1395_v2, 0.0  ;;  %v1800_v5 = vpop.f32.mrb[10].mxu0  ;;  %v439_v41 = vmax.f32 %v437_v25, %v438_v33 }
 0x254   :  { %v1400_v6 = vsel %vm433_vm13, %v1398_v3, -inf  ;;  %v2552_v7 = vpop.f32.mrb[11].mxu0 }
 0x255   :  { %v1399_v8 = vsel %vm431_vm14, %v1397_v4, -inf  ;;  %v440_v46 = vrot.slane %v439_v41, 1 }
 0x256   :  { %v1401_v10 = vmax.f32 %v1399_v8, %v1400_v6 }
 0x257   :  { %v1870_v11 = vpop.f32.mrb[12].mxu0  ;;  %v441_v9 = vmax.f32 %v439_v41, %v440_v46 }
 0x258   :  { %v1871_v12 = vadd.f32 %v1870_v11, %v1800_v5  ;;  %v2559_v14 = vpop.f32.mrb[13].mxu0  ;;  %v1402_v59 = vrot.slane %v1401_v10, 4 }
 0x25a   :  { %v1403_v63 = vmax.f32 %v1401_v10, %v1402_v59 }
 0x25b   :  { %v2011_v17 = vpop.f32.mrb[14].mxu0 }
 0x25c   :  { %v2573_v18 = vpop.f32.mrb[15].mxu0  ;;  %v1404_v7 = vrot.slane %v1403_v63, 2 }
 0x260   :  { %v2461_v21 = vpop.f32.mrb[6].mxu1 }
 0x261   :  { %v759_v22 = vadd.f32 %v2461_v21, %v757_v19  ;;  %v743_v23 = vpop.f32.mrb[7].mxu1  ;;  %v1405_v21 = vmax.f32 %v1403_v63, %v1404_v7 }
 0x262   :  { %v758_v24 = vadd.f32 %v757_v19, %v743_v23 }
 0x263   :  { %v761_v26 = vmax.f32 %v759_v22, 0.0 }
 0x264   :  { %v760_v28 = vmax.f32 %v758_v24, 0.0  ;;  %v979_v29 = vpop.f32.mrb[8].mxu1  ;;  %v1406_v24 = vrot.slane %v1405_v21, 1 }
 0x265   :  { %v764_v30 = vsel %vm763_vm15, %v761_v26, -inf  ;;  %v983_v31 = vadd.f32 %v979_v29, %v910_v48  ;;  %v2482_v13 = vpop.f32.mrb[9].mxu1 }
 0x266   :  { %v762_v32 = vsel %vm431_vm14, %v760_v28, -inf  ;;  %v1407_v29 = vmax.f32 %v1405_v21, %v1406_v24 }
 0x267   :  { %v765_v34 = vmax.f32 %v762_v32, %v764_v30  ;;  %v1054_v35 = vadd.f32 %v1050_v51, %v983_v31 }
 0x268   :  { %v1127_v37 = vpop.f32.mrb[10].mxu1 }
 0x269   :  { %v766_v38 = vrot.slane %v765_v34, 4  ;;  %v1131_v39 = vadd.f32 %v1127_v37, %v1054_v35  ;;  %v2496_v40 = vpop.f32.mrb[11].mxu1 }
 0x26b   :  { %v767_v42 = vmax.f32 %v765_v34, %v766_v38  ;;  %v1136_v43 = vadd.f32 %v1135_v36, %v1131_v39 }
 0x26d   :  { %v768_v44 = vrot.slane %v767_v42, 2  ;;  %v1137_v45 = vmax.f32 %v1136_v43, 0.0 }
 0x26f   :  { %v769_v47 = vmax.f32 %v767_v42, %v768_v44  ;;  %v1138_v48 = vsel %vm431_vm14, %v1137_v45, -inf }
 0x270   :  { %v1139_v49 = vrot.slane %v1138_v48, 4 }
 0x271   :  { %v770_v50 = vrot.slane %v769_v47, 1 }
 0x272   :  { %v1140_v52 = vmax.f32 %v1138_v48, %v1139_v49 }
 0x273   :  { %v771_v54 = vmax.f32 %v769_v47, %v770_v50 }
 0x274   :  { %v1141_v51 = vrot.slane %v1140_v52, 2 }
 0x275   :  { %v772_v53 = vadd.f32 %v771_v54, %v441_v9 }
 0x276   :  { %v1142_v55 = vmax.f32 %v1140_v52, %v1141_v51 }
 0x278   :  { %v1143_v56 = vrot.slane %v1142_v55, 1 }
 0x27a   :  { %v1144_v57 = vmax.f32 %v1142_v55, %v1143_v56 }
 0x27c   :  { %v1145_v58 = vadd.f32 %v1144_v57, %v772_v53 }
 0x284   :  { %v2545_v60 = vpop.f32.mrb[12].mxu1 }
 0x285   :  { %v1721_v61 = vadd.f32 %v2545_v60, %v757_v19  ;;  %v1709_v16 = vpop.f32.mrb[13].mxu1 }
 0x286   :  { %v1720_v62 = vadd.f32 %v1709_v16, %v757_v19 }
 0x287   :  { %v1723_v0 = vmax.f32 %v1721_v61, 0.0 }
 0x288   :  { %v1722_v1 = vmax.f32 %v1720_v62, 0.0  ;;  %v1940_v2 = vpop.f32.mrb[14].mxu1 }
 0x289   :  { %v1725_v3 = vsel %vm763_vm15, %v1723_v0, -inf  ;;  %v1944_v4 = vadd.f32 %v1940_v2, %v1871_v12  ;;  %v2566_v5 = vpop.f32.mrb[15].mxu1 }
 0x28a   :  { %v1724_v6 = vsel %vm431_vm14, %v1722_v1, -inf }
 0x28b   :  { %v1726_v8 = vmax.f32 %v1724_v6, %v1725_v3  ;;  %v2015_v11 = vadd.f32 %v2011_v17, %v1944_v4 }
 0x28c   :  { %v2084_v14 = vpop.f32.mrb[16].mxu1 }
 0x28d   :  { %v1727_v15 = vrot.slane %v1726_v8, 4  ;;  %v2088_v18 = vadd.f32 %v2084_v14, %v2015_v11  ;;  %v2580_v20 = vpop.f32.mrb[17].mxu1 }
 0x28f   :  { %v1728_v22 = vmax.f32 %v1726_v8, %v1727_v15  ;;  %v2089_v19 = vadd.f32 %v2088_v18, %v1135_v36  ;;  %v2279_v36 = vld [vmem:[%s3269_s5] ss:$0 sm:$0xff] }
 0x291   :  { %v1729_v10 = vrot.slane %v1728_v22, 2  ;;  %v2090_v23 = vmax.f32 %v2089_v19, 0.0 }
 0x293   :  { %v1730_v25 = vmax.f32 %v1728_v22, %v1729_v10  ;;  %v2091_v26 = vsel %vm431_vm14, %v2090_v23, -inf }
 0x294   :  { %v2092_v12 = vrot.slane %v2091_v26, 4 }
 0x295   :  { %v1731_v27 = vrot.slane %v1730_v25, 1 }
 0x296   :  { %v2093_v28 = vmax.f32 %v2091_v26, %v2092_v12 }
 0x297   :  { %v1732_v30 = vmax.f32 %v1730_v25, %v1731_v27 }
 0x298   :  { %v2094_v31 = vrot.slane %v2093_v28, 2 }
 0x299   :  { %v1733_v17 = vadd.f32 %v1732_v30, %v1407_v29 }
 0x29a   :  { %v2095_v13 = vmax.f32 %v2093_v28, %v2094_v31 }
 0x29c   :  { %v2096_v32 = vrot.slane %v2095_v13, 1 }
 0x29e   :  { %v2097_v33 = vmax.f32 %v2095_v13, %v2096_v32 }
 0x2a0   :  { %v2098_v34 = vadd.f32 %v2097_v33, %v1733_v17 }
 0x2a2   :  { %v2099_v35 = vsel %vm1635_vm12, %v1145_v58, %v2098_v34 }
 0x2a3   :  { %2606 = vmatmul.mubr.msk.f32.vlgmr.msra.gmra.mrb[16].mxu0 %vm431_vm14, %v2099_v35  ;;  %2100 = vst.msk [vmem:[#allocation4] sm:$0x3] %vm433_vm13, %v2099_v35 }
 0x376   :  { %v2189_v37 = vpop.f32.mrb[16].mxu0 }
 0x377   :  { %v2190_v38 = vadd.f32 %v2279_v36, %v2189_v37  ;;  %v2607_v39 = vpop.f32.mrb[17].mxu0 }
 0x379   :  { %v2194_v40 = vsel %vm2193_vm0, %v2190_v38, -inf }
 0x37a   :  { %2195 = vmax.xlane.f32.xlu1 %v2194_v40 }
 0x407   :  { %v2196_v41 = vpop.xlane.xlu1 %2195 }
 0x408   :  { %v2197_v42 = vsub.f32 %v2190_v38, %v2196_v41 }
 0x40a   :  { %v2198_v43 = vmul.f32 1.442695, %v2197_v42 }
 0x40c   :  { %2757 = vpow2.f32 %v2198_v43 }
 0x416   :  { %v2758_v44 = vpop.eup %2757 }
 0x417   :  { %v2200_v45 = vsel %vm2193_vm0, %v2758_v44, 0.0 }
 0x418   :  { %2201 = vadd.xlane.f32.xlu0 %v2200_v45 }
 0x419   :  { %2772 = shalt.err (!%p2769_p4)
}
 0x41a   :  { %s2773_s20 = scalar_lea.hbm %s3271_s7, 32 }
 0x41b   :  { %p2774_p5 = scmp.ne.s32.totalorder %s3271_s7, %s2773_s20  ;;  %p2777_p6 = scmp.lt.u32.totalorder %s2773_s20, %s3271_s7 }
 0x41d   :  { %p2779_p7 = pnand %p2777_p6, %p2774_p5 }
 0x41f   :  { %2782 = shalt.err (!%p2779_p7)
}
 0x420   :  { %2228 = dma.vmem_to_hbm [thread:$0]  %s2226_s0, 32, %s3271_s7, [#allocation5]  }
 0x421   :  { %s2814_s27 = smov [#allocation2]  }
 0x422   :  { %s2215_s28 = sshll.u32 %s2814_s27, 4  ;;  %s2216_s28 = int_to_ptr.vmem [resolvable:$true] %s2215_s28 }
 0x423   :  { %s2783_s29 = scalar_lea.vmem %s2216_s28, 32  ;;  %p2788_p9 = scmp.lt.s32.totalorder %s2216_s28, %s2216_s28 }
 0x424   :  { %p2784_p8 = scmp.ne.s32.totalorder %s2216_s28, %s2783_s29  ;;  %p2789_p10 = scmp.lt.s32.totalorder %s2783_s29, %s2783_s29 }
 0x426   :  { %p2790_p11 = por %p2789_p10, %p2788_p9 }
 0x428   :  { %p2791_p12 = pnand %p2790_p11, %p2784_p8 }
 0x4a5   :  { %v2202_v46 = vpop.xlane.xlu0 %2201 }
 0x4a6   :  { %2759 = vrcp.f32 %v2202_v46 }
 0x4b0   :  { %v2760_v47 = vpop.eup %2759 }
 0x4b1   :  { %v2204_v48 = vmul.f32 %v2760_v47, %v2202_v46 }
 0x4b3   :  { %v2205_v49 = vsub.f32 2.0, %v2204_v48 }
 0x4b5   :  { %v2206_v50 = vmul.f32 %v2760_v47, %v2205_v49 }
 0x4b7   :  { %v2207_v52 = vmul.f32 %v2758_v44, %v2206_v50 }
 0x4b9   :  { %2208 = vst.msk [vmem:[#allocation2] sm:$0x3] %vm2193_vm0, %v2207_v52 }
 0x4ba   :  { %2794 = shalt.err (!%p2791_p12)
}
 0x4bb   :  { %s2795_s8 = scalar_lea.hbm %s3270_s6, 32 }
 0x4bc   :  { %p2796_p13 = scmp.ne.s32.totalorder %s3270_s6, %s2795_s8  ;;  %p2799_p0 = scmp.lt.u32.totalorder %s2795_s8, %s3270_s6 }
 0x4be   :  { %p2801_p1 = pnand %p2799_p0, %p2796_p13 }
 0x4c0   :  { %2804 = shalt.err (!%p2801_p1)
}
 0x4c1   :  { %2218 = dma.vmem_to_hbm [thread:$0]  %s2216_s28, 32, %s3270_s6, [#allocation3]  }
 0x4c2   :  { %2805 = dma.done.wait [#allocation3], 32  }
 0x4c3   :  { %2806 = vsyncadd [#allocation3], 4294967264 }
 0x4c4   :  { %2807 = dma.done.wait [#allocation5], 32  }
 0x4c5   :  { %2808 = vsyncadd [#allocation5], 4294967264 }
 0x4c6   :  { %2235 = vsyncpa [#allocation3], 1 }
 0x4c7   :  { %2236 = vsyncpa [#allocation5], 1 }

</bundles_post_ra>
